<compile_context>
chip_gen: v5e
topology: v5e:2x2
jax: 0.10.0
libtpu: 0.0.40
codegen_flags: <defaults>
</compile_context>

<pallas_src>
import jax
import jax.numpy as jnp
from jax import lax
from jax.experimental import pallas as pl
from jax.experimental.pallas import tpu as pltpu

_LANES = 128


def _sublane_multiple(dtype):
    """Sublane packing granularity: 8 for 4-byte, 16 for 2-byte, 32 for 1-byte."""
    return max(8, 32 // jnp.dtype(dtype).itemsize)


def _pick_chunk(tg, sub):
    """Sublane chunk size for the in-kernel MAC loop (bounds vreg live range)."""
    for c in (4 * sub, 2 * sub, sub):
        if tg % c == 0:
            return c
    return tg


def _mac_chunk(x_ref, w_ref, start, chunk):
    """One (tb, chunk, 128) multiply-accumulate -> (tb, 128) partial sums."""
    xc = x_ref[:, pl.ds(start, chunk), :].astype(jnp.float32)
    wc = w_ref[pl.ds(start, chunk), :].astype(jnp.float32)
    # TODO(synk): on v6e/v7x the multiply could stay in bf16 (VPU supports it)
    # and only the sublane-sum promote to f32; kept in f32 for exactness.
    return jnp.sum(xc * wc[None, :, :], axis=1)


def _ff_kernel(bias_ref, x_ref, w_ref, o_ref, acc_ref):
    """Grid step: MAC a (tb, tg, 128) x-tile against a (tg, 128) weight tile
    into a lane-dense (tb, 128) f32 accumulator; epilogue does the single
    cross-lane reduce, the bias add and the output cast."""
    k = pl.program_id(1)

    @pl.when(k == 0)
    def _():
        acc_ref[...] = jnp.zeros_like(acc_ref)

    tg = x_ref.shape[1]
    sub = _sublane_multiple(x_ref.dtype)
    chunk = _pick_chunk(tg, sub)
    n_ch = tg // chunk

    if n_ch <= 8:
        # Short static trip count: fully static slices, bounded live ranges.
        acc = acc_ref[...]
        for i in range(n_ch):
            acc = acc + _mac_chunk(x_ref, w_ref, i * chunk, chunk)
        acc_ref[...] = acc
    else:
        def body(i, acc):
            s = pl.multiple_of(i * chunk, chunk)
            return acc + _mac_chunk(x_ref, w_ref, s, chunk)

        acc_ref[...] = lax.fori_loop(0, n_ch, body, acc_ref[...])

    @pl.when(k == pl.num_programs(1) - 1)
    def _():
        total = jnp.sum(acc_ref[...], axis=1, keepdims=True)      # (tb, 1) f32
        o_ref[...] = (total + bias_ref[0, 0]).astype(o_ref.dtype)


def _chip_config():
    """(per-x-tile budget, vmem_limit cap, #TensorCores) by TPU generation."""
    kind = ""
    try:
        kind = jax.devices()[0].device_kind.lower()
    except Exception:
        pass
    is_v7 = "v7" in kind
    big_vmem = ("v5" in kind) or ("v6" in kind)        # 128 MiB physical VMEM
    x_budget = (12 << 20) if big_vmem else (6 << 20)   # per x tile
    vmem_cap = (64 << 20) if big_vmem else (40 << 20)  # requested scoped limit
    num_tc = 2 if is_v7 else 1
    return x_budget, vmem_cap, num_tc


def _batch_tile_candidates(B):
    """Divisors of B that satisfy the output block rule (mult of 8, or == B)."""
    cands = [d for d in range(8, B, 8) if B % d == 0]
    cands.append(B)
    return sorted(set(cands))


def _choose_tiles(B, G, itemsize, dtype):
    """Batch-first tiling: keep tg = G and tile batch; k-tile only as fallback."""
    x_budget, vmem_cap, num_tc = _chip_config()
    row_bytes = G * _LANES * itemsize
    sub = _sublane_multiple(dtype)

    cands = _batch_tile_candidates(B)
    fitting = [d for d in cands if d * row_bytes <= x_budget]

    if fitting:
        if num_tc >= 2 and B >= 16:
            multi = [d for d in fitting if B // d >= 2]  # feed both TCs
            tb = max(multi) if multi else max(fitting)
        else:
            tb = max(fitting)                            # no gratuitous split
        tg = G
    else:
        # Even the smallest legal batch tile blows the budget -> shrink tg.
        tb = cands[0]
        tg = None
        for c in range(sub, G, sub):
            if G % c == 0 and tb * c * _LANES * itemsize <= x_budget:
                tg = c
        if tg is None:
            tg = sub if G % sub == 0 else G  # last resort; vmem_limit covers it
    return tb, tg, vmem_cap


def feed_forward_block(x_nchw, weight, bias):
    """x_nchw: (B, C, H, W); weight: (F, 1) (= nn.Linear.weight.T); bias: (1,).

    Returns (B, 1) = flatten(x) @ weight + bias, matching FeedForwardBlock.
    """
    B = x_nchw.shape[0]
    F = int(weight.size)
    assert x_nchw.size == B * F, "weight size must match C*H*W"

    out_dtype = x_nchw.dtype
    itemsize = jnp.dtype(x_nchw.dtype).itemsize

    x_flat = x_nchw.reshape(B, F)          # same row-major order as nn.Flatten
    w_flat = weight.reshape(-1)

    if F % _LANES != 0:                    # pad flatten dim to lane multiple
        pad = _LANES - F % _LANES
        x_flat = jnp.pad(x_flat, ((0, 0), (0, pad)))
        w_flat = jnp.pad(w_flat, (0, pad))
        F = F + pad
    G = F // _LANES

    x3 = x_flat.reshape(B, G, _LANES)      # lane/sublane-dense layout
    w2 = w_flat.reshape(G, _LANES)
    bias2 = jnp.asarray(bias, jnp.float32).reshape(1, 1)

    tb, tg, vmem_cap = _choose_tiles(B, G, itemsize, x_nchw.dtype)
    n_b = B // tb
    n_k = G // tg

    # VMEM accounting: double-buffered x and w blocks + output + accumulator.
    x_tile = tb * tg * _LANES * itemsize
    w_tile = tg * _LANES * itemsize
    out_tile = tb * jnp.dtype(out_dtype).itemsize
    acc_bytes = tb * _LANES * 4
    need = 2 * x_tile + 2 * w_tile + 2 * out_tile + acc_bytes
    vmem_limit = min(max(16 << 20, int(1.5 * need) + (2 << 20)), vmem_cap)
    vmem_limit = int(max(vmem_limit, need + (1 << 20)))

    out = pl.pallas_call(
        _ff_kernel,
        out_shape=jax.ShapeDtypeStruct((B, 1), out_dtype),
        grid_spec=pltpu.PrefetchScalarGridSpec(
            num_scalar_prefetch=0,
            grid=(n_b, n_k),
            in_specs=[
                # Bias: tiny SMEM operand, added in the kernel epilogue.
                pl.BlockSpec(memory_space=pltpu.MemorySpace.SMEM),
                # x: contiguous (tb, tg, 128) slab per step.
                pl.BlockSpec((tb, tg, _LANES), lambda b, k: (b, k, 0)),
                # w: constant block index across b (and across k when n_k == 1)
                # -> fetched once and held resident in VMEM.
                pl.BlockSpec((tg, _LANES), lambda b, k: (k, 0)),
            ],
            out_specs=pl.BlockSpec((tb, 1), lambda b, k: (b, 0)),
            scratch_shapes=[pltpu.VMEM((tb, _LANES), jnp.float32)],
        ),
        compiler_params=pltpu.CompilerParams(
            dimension_semantics=("parallel", "arbitrary"),
            vmem_limit_bytes=vmem_limit,
        ),
    )(bias2, x3, w2)

    return out


if __name__ == "__main__":
    # Small shapes consistent with the module: B=2, C=4, H=16, W=16 -> F=1024.
    B, C, H, W = 2, 4, 16, 16
    F = C * H * W

    key = jax.random.PRNGKey(0)
    kx, kw, kb = jax.random.split(key, 3)

    x = jax.random.normal(kx, (B, C, H, W), dtype=jnp.float32)

    # Deterministic params, matching nn.Linear's uniform(-1/sqrt(F), 1/sqrt(F)) init.
    bound = 1.0 / jnp.sqrt(jnp.float32(F))
    weight = jax.random.uniform(kw, (F, 1), minval=-bound, maxval=bound,
                                dtype=jnp.float32)
    bias = jax.random.uniform(kb, (1,), minval=-bound, maxval=bound,
                              dtype=jnp.float32)

    out = feed_forward_block(x, weight, bias)
    out = jax.block_until_ready(out)

    # Reference check in plain JAX (same math as the PyTorch module).
    ref = x.reshape(B, F) @ weight + bias
    assert out.shape == (B, 1)
    assert jnp.allclose(out, ref, atol=1e-4, rtol=1e-4)

    print("KERNEL_OK")
</pallas_src>

<mosaic_0001>
module attributes {stable_mosaic.version = 11 : i64} {
  func.func @_ff_kernel(%arg0: i32, %arg1: i32, %arg2: memref<1x1xf32, #tpu.memory_space<smem>>, %arg3: memref<2x8x128xf32, #tpu.memory_space<vmem>>, %arg4: memref<8x128xf32, #tpu.memory_space<vmem>>, %arg5: memref<2x1xf32, #tpu.memory_space<vmem>>, %arg6: memref<2x128xf32, #tpu.memory_space<vmem>>) attributes {dimension_semantics = [#tpu.dimension_semantics<parallel>, #tpu.dimension_semantics<arbitrary>], iteration_bounds = array<i64: 1, 1>, scalar_prefetch = 0 : i64, scratch_operands = 1 : i64, tpu.core_type = #tpu.core_type<tc>, window_params = [{transform_indices = @transform_0, window_bounds = array<i64: 1, 1>}, {transform_indices = @transform_1, window_bounds = array<i64: 2, 8, 128>}, {transform_indices = @transform_2, window_bounds = array<i64: 8, 128>}, {transform_indices = @transform_3, window_bounds = array<i64: 2, 1>}]} {
    %c0_i32 = arith.constant 0 : i32
    %0 = arith.cmpi eq, %arg1, %c0_i32 : i32
    %1 = arith.extui %0 : i1 to i32
    %c0_i32_0 = arith.constant 0 : i32
    %2 = arith.cmpi ne, %1, %c0_i32_0 : i32
    scf.if %2 {
      %cst_11 = arith.constant 0.000000e+00 : f32
      %15 = vector.broadcast %cst_11 : f32 to vector<2x128xf32>
      %c0_12 = arith.constant 0 : index
      %c0_13 = arith.constant 0 : index
      %16 = vector.load %arg6[%c0_12, %c0_13] : memref<2x128xf32, #tpu.memory_space<vmem>>, vector<2x128xf32>
      tpu.vector_store %arg6[%c0_12, %c0_13], %15 {strides = array<i32>} : memref<2x128xf32, #tpu.memory_space<vmem>>, vector<2x128xf32>,
    } else {
    }
    %c0 = arith.constant 0 : index
    %c0_1 = arith.constant 0 : index
    %3 = vector.load %arg6[%c0, %c0_1] : memref<2x128xf32, #tpu.memory_space<vmem>>, vector<2x128xf32>
    %c0_2 = arith.constant 0 : index
    %c0_3 = arith.constant 0 : index
    %c0_4 = arith.constant 0 : index
    %4 = vector.load %arg3[%c0_2, %c0_3, %c0_4] : memref<2x8x128xf32, #tpu.memory_space<vmem>>, vector<2x8x128xf32>
    %c0_5 = arith.constant 0 : index
    %c0_6 = arith.constant 0 : index
    %5 = vector.load %arg4[%c0_5, %c0_6] : memref<8x128xf32, #tpu.memory_space<vmem>>, vector<8x128xf32>
    %6 = vector.shape_cast %5 : vector<8x128xf32> to vector<1x8x128xf32>
    %7 = vector.broadcast %6 : vector<1x8x128xf32> to vector<2x8x128xf32>
    %8 = arith.mulf %4, %7 : vector<2x8x128xf32>
    %cst = arith.constant dense<0.000000e+00> : vector<2x128xf32>
    %9 = vector.multi_reduction <add>, %8, %cst [1] : vector<2x8x128xf32> to vector<2x128xf32>
    %10 = arith.addf %3, %9 : vector<2x128xf32>
    %c0_7 = arith.constant 0 : index
    %c0_8 = arith.constant 0 : index
    %11 = vector.load %arg6[%c0_7, %c0_8] : memref<2x128xf32, #tpu.memory_space<vmem>>, vector<2x128xf32>
    tpu.vector_store %arg6[%c0_7, %c0_8], %10 {strides = array<i32>} : memref<2x128xf32, #tpu.memory_space<vmem>>, vector<2x128xf32>,
    %c0_i32_9 = arith.constant 0 : i32
    %12 = arith.cmpi eq, %arg1, %c0_i32_9 : i32
    %13 = arith.extui %12 : i1 to i32
    %c0_i32_10 = arith.constant 0 : i32
    %14 = arith.cmpi ne, %13, %c0_i32_10 : i32
    scf.if %14 {
      %c0_11 = arith.constant 0 : index
      %c0_12 = arith.constant 0 : index
      %15 = vector.load %arg6[%c0_11, %c0_12] : memref<2x128xf32, #tpu.memory_space<vmem>>, vector<2x128xf32>
      %cst_13 = arith.constant dense<0.000000e+00> : vector<2xf32>
      %16 = vector.multi_reduction <add>, %15, %cst_13 [1] : vector<2x128xf32> to vector<2xf32>
      %17 = vector.shape_cast %16 : vector<2xf32> to vector<2x1xf32>
      %c0_14 = arith.constant 0 : index
      %c0_15 = arith.constant 0 : index
      %18 = memref.load %arg2[%c0_14, %c0_15] : memref<1x1xf32, #tpu.memory_space<smem>>
      %19 = vector.broadcast %18 : f32 to vector<2x1xf32>
      %20 = arith.addf %17, %19 : vector<2x1xf32>
      %c0_16 = arith.constant 0 : index
      %c0_17 = arith.constant 0 : index
      %21 = vector.load %arg5[%c0_16, %c0_17] : memref<2x1xf32, #tpu.memory_space<vmem>>, vector<2x1xf32>
      tpu.vector_store %arg5[%c0_16, %c0_17], %20 {strides = array<i32>} : memref<2x1xf32, #tpu.memory_space<vmem>>, vector<2x1xf32>,
    } else {
    }
    return
  }
  func.func @transform_0(%arg0: i32, %arg1: i32) -> (i32, i32) {
    %c0_i32 = arith.constant 0 : i32
    %c0_i32_0 = arith.constant 0 : i32
    %c0_i32_1 = arith.constant 0 : i32
    return %c0_i32, %c0_i32_0 : i32, i32
  }
  func.func @transform_1(%arg0: i32, %arg1: i32) -> (i32, i32, i32) {
    %c0_i32 = arith.constant 0 : i32
    %c0_i32_0 = arith.constant 0 : i32
    return %arg0, %arg1, %c0_i32 : i32, i32, i32
  }
  func.func @transform_2(%arg0: i32, %arg1: i32) -> (i32, i32) {
    %c0_i32 = arith.constant 0 : i32
    %c0_i32_0 = arith.constant 0 : i32
    return %arg1, %c0_i32 : i32, i32
  }
  func.func @transform_3(%arg0: i32, %arg1: i32) -> (i32, i32) {
    %c0_i32 = arith.constant 0 : i32
    %c0_i32_0 = arith.constant 0 : i32
    return %arg0, %c0_i32 : i32, i32
  }
}

</mosaic_0001>

<bundles_post_ra>
// kernel: tpu_custom_call.1
= control target key start
LH: loop header
LB: loop body
LE: loop exit
PB: predicated region body
PF: predicated region fallthrough
CT: control target
= control target key end

     0   :  { %9 = vsyncpa [#allocation5], 0  ;;  %s188_s0 = inlined_call_operand.<no memory space> [shape: f32[1,1], index: 0, kind: input, shape index: {}]   ;;  %s189_s1 = inlined_call_operand.hbm [shape: f32[2,8,128], index: 1, kind: input, shape index: {}]   ;;  %s190_s2 = inlined_call_operand.hbm [shape: f32[8,128], index: 2, kind: input, shape index: {}]   ;;  %s191_s3 = inlined_call_operand.vmem [shape: f32[2,1], index: 3, kind: output, shape index: {}]  }
   0x1   :  { %s17_s14 = sshll.u32 %s189_s1, 4  ;;  %s18_s14 = int_to_ptr.hbm [resolvable:$true] %s17_s14 }
   0x2   :  { %10 = vsyncpa [#allocation7], 0  ;;  %s151_s15 = smov [#allocation4]   ;;  %s31_s19 = sshll.u32 %s190_s2, 4  ;;  %s32_s19 = int_to_ptr.hbm [resolvable:$true] %s31_s19 }
   0x3   :  { %s19_s16 = sshll.u32 %s151_s15, 4  ;;  %s152_s20 = smov 128   ;;  %s20_s16 = int_to_ptr.vmem [resolvable:$true] %s19_s16 }
   0x4   :  { %s153_s21 = smov 8   ;;  %s154_s22 = smov [#allocation6]  }
   0x5   :  { %25 = dma.hbm_to_vmem [thread:$0]  %s18_s14, 256, %s20_s16, [#allocation5], %s152_s20, %s152_s20, %s153_s21  }
   0x6   :  { %s33_s23 = sshll.u32 %s154_s22, 4  ;;  %s34_s23 = int_to_ptr.vmem [resolvable:$true] %s33_s23 }
   0x7   :  { %36 = dma.hbm_to_vmem [thread:$0]  %s32_s19, 128, %s34_s23, [#allocation7]  }
   0x8   :  { %147 = dma.done.wait [#allocation5], 256  }
   0x9   :  { %148 = vsyncadd [#allocation5], 4294967040 }
   0xa   :  { %149 = dma.done.wait [#allocation7], 128  }
   0xb   :  { %150 = vsyncadd [#allocation7], 4294967168  ;;  %v155_v0 = vmov 0.0   ;;  %v51_v1 = vld [vmem:[#allocation4] sm:$0xff]  ;;  %v52_v2 = vld [vmem:[#allocation4 + $0x8] sm:$0xff]  ;;  %vm70_vm0 = vcmask 1041409   ;;  %v84_v23 = vstv %s188_s0 }
   0xc   :  { %49 = vst [vmem:[#allocation2] sm:$0x3] %v155_v0  ;;  %v53_v3 = vld [vmem:[#allocation6] sm:$0xff]  ;;  %vm79_vm1 = vcmask 1041408   ;;  %vm86_vm2 = vcmask 1024  }
   0xd   :  { %v54_v4 = vmul.f32 %v53_v3, %v51_v1  ;;  %v55_v5 = vmul.f32 %v53_v3, %v52_v2 }
   0xf   :  { %v56_v6 = vrot.slane %v54_v4, 4  ;;  %v62_v7 = vrot.slane %v55_v5, 4 }
  0x11   :  { %v57_v8 = vadd.f32 %v56_v6, %v54_v4  ;;  %v63_v9 = vadd.f32 %v62_v7, %v55_v5 }
  0x13   :  { %v58_v10 = vrot.slane %v57_v8, 2  ;;  %v64_v11 = vrot.slane %v63_v9, 2  ;;  %v50_v16 = vld [vmem:[#allocation2] sm:$0x3] }
  0x15   :  { %v59_v12 = vadd.f32 %v58_v10, %v57_v8  ;;  %v65_v13 = vadd.f32 %v64_v11, %v63_v9 }
  0x17   :  { %v60_v14 = vrot.slane %v59_v12, 1  ;;  %v66_v15 = vrot.slane %v65_v13, 1 }
  0x19   :  { %v61_v17 = vadd.f32 %v60_v14, %v59_v12  ;;  %v67_v18 = vadd.f32 %v66_v15, %v65_v13 }
  0x1b   :  { %v71_v19 = vsel %vm70_vm0, %v67_v18, %v61_v17 }
  0x1c   :  { %v73_v20 = vadd.f32 %v71_v19, %v50_v16 }
  0x1e   :  { %74 = vst [vmem:[#allocation2] sm:$0x3] %v73_v20 }
  0x25   :  { %v78_v21 = vld [vmem:[#allocation2] sm:$0x3] }
  0x26   :  { %v80_v22 = vsel %vm79_vm1, %v78_v21, 0.0 }
  0x27   :  { %81 = vadd.xlane.f32.xlu0 %v80_v22 }
  0x9a   :  { %v82_v24 = vpop.xlane.xlu0 %81 }
  0x9b   :  { %v85_v25 = vadd.f32 %v84_v23, %v82_v24 }
  0x9d   :  { %87 = vst.msk [vmem:[%s191_s3] sm:$0x3] %vm86_vm2, %v85_v25 }
  0x9e   :  { %92 = vsyncpa [#allocation5], 1 }
  0x9f   :  { %93 = vsyncpa [#allocation7], 1 }

</bundles_post_ra>
